<compile_context>
chip_gen: v6e
topology: v6e:2x2x1
jax: 0.10.0
libtpu: 0.0.40
codegen_flags: <defaults>
</compile_context>

<pallas_src>
import jax
import jax.numpy as jnp
from jax.experimental import pallas as pl
from jax.experimental.pallas import tpu as pltpu


EPS = 1e-12      # torch.nn.functional.normalize default eps
LANE = 128
SUBLANE = 8


def _round_up(v, m):
    return ((v + m - 1) // m) * m


def _encoder_kernel(a_ref, xsrc_ref, xrow_ref, wsr_ref, bl_ref, wc_ref,
                    feat_ref, out_ref):
    # --- SAGEConv (aggr='mean'): one bf16 MXU pass, f32 accumulation -------
    agg = jnp.dot(a_ref[...], xsrc_ref[...],
                  preferred_element_type=jnp.float32)              # [TM, Dp]

    # Fused lin_l / lin_r:  [agg | x] @ [[Wl], [Wr]]   (K = 2*Dp MXU fill)
    h = jnp.concatenate([agg, xrow_ref[...]], axis=1)              # [TM, 2*Dp]
    x1 = jnp.dot(h, wsr_ref[...],
                 preferred_element_type=jnp.float32) + bl_ref[...]  # [TM, Dp]
    feat_ref[...] = x1

    # --- NormedLinear_new x2 (fused, lane-dense output) ---------------------
    #   normalize(x1, dim=1) @ Wn  ==  (x1 @ Wn) * 1/max(||x1||, eps)
    sq = jnp.sum(x1 * x1, axis=1, keepdims=True)                   # [TM, 1]
    inv_norm = pl.reciprocal(jnp.maximum(jnp.sqrt(sq), EPS), approx=True)
    out_ref[...] = jnp.dot(x1, wc_ref[...],
                           preferred_element_type=jnp.float32) * inv_norm


def encoder_modified2(x, edge_index, params, *, max_tile=512):
    """Forward pass of Encoder_modified2.

    x:          [N, D] float32 node features
    edge_index: [2, E] int32 (row 0 = source j, row 1 = target i)
    params:     dict with 'wl' [D,D], 'bl' [D], 'wr' [D,D],
                'w1' [D,C1], 'w2' [D,C2]   (weights stored as [in, out])
    returns (out1 [N,C1], out2 [N,C2], out_feat [N,D])
    """
    N, D = x.shape
    C1 = params["w1"].shape[1]
    C2 = params["w2"].shape[1]

    # --- glue: dense row-normalized mean-aggregation matrix from edges ------
    # TODO(synk): for large sparse graphs replace the dense O(N^2) A with a
    # scalar-prefetched CSR / padded edge-list gather-aggregate in-kernel.
    src, dst = edge_index[0], edge_index[1]
    counts = jnp.zeros((N, N), jnp.float32).at[dst, src].add(1.0)
    in_deg = counts.sum(axis=1, keepdims=True)
    a = counts / jnp.maximum(in_deg, 1.0)   # zero in-degree rows stay all-zero

    # --- padded, lane-dense shapes ------------------------------------------
    Dp = _round_up(D, LANE)                 # feature dim -> 128 lanes
    Cp = _round_up(C1 + C2, LANE)           # fused class dim -> 128 lanes
    Nc = _round_up(N, LANE)                 # contraction dim (A cols / x rows)

    tm = max_tile                           # row tile; cap A double-buffer ~8 MiB
    while tm > SUBLANE and 2 * tm * Nc * 2 > 8 * 1024 * 1024:
        tm //= 2
    tm = min(tm, _round_up(N, SUBLANE))
    Nr = _round_up(N, tm)                   # padded row dim (A rows / outputs)

    a_p = jnp.zeros((Nr, Nc), jnp.bfloat16).at[:N, :N].set(a.astype(jnp.bfloat16))
    x_src = jnp.zeros((Nc, Dp), jnp.bfloat16).at[:N, :D].set(x.astype(jnp.bfloat16))
    x_row = jnp.zeros((Nr, Dp), jnp.float32).at[:N, :D].set(x)

    wl, wr, bl = params["wl"], params["wr"], params["bl"]
    w_sr = (jnp.zeros((2 * Dp, Dp), jnp.float32)
            .at[:D, :D].set(wl)
            .at[Dp:Dp + D, :D].set(wr))
    bl_p = jnp.zeros((1, Dp), jnp.float32).at[0, :D].set(bl)

    # Column-normalize W1/W2 once in the wrapper (independent of x), fuse them.
    def col_norm(w):
        return w / jnp.maximum(jnp.linalg.norm(w, axis=0, keepdims=True), EPS)

    wc = jnp.concatenate([col_norm(params["w1"]), col_norm(params["w2"])], axis=1)
    wc_p = jnp.zeros((Dp, Cp), jnp.float32).at[:D, :C1 + C2].set(wc)

    grid = (Nr // tm,)
    full = lambda i: (0, 0)
    tiled = lambda i: (i, 0)

    feat_p, out_p = pl.pallas_call(
        _encoder_kernel,
        out_shape=(
            jax.ShapeDtypeStruct((Nr, Dp), jnp.float32),
            jax.ShapeDtypeStruct((Nr, Cp), jnp.float32),
        ),
        grid=grid,
        in_specs=[
            pl.BlockSpec((tm, Nc), tiled),      # A row tile (bf16)
            pl.BlockSpec((Nc, Dp), full),       # x, source side (bf16, resident)
            pl.BlockSpec((tm, Dp), full if Nr == tm else tiled)
            if False else pl.BlockSpec((tm, Dp), tiled),  # x row tile (f32)
            pl.BlockSpec((2 * Dp, Dp), full),   # [Wl ; Wr]
            pl.BlockSpec((1, Dp), full),        # lin_l bias
            pl.BlockSpec((Dp, Cp), full),       # pre-normalized [W1 | W2]
        ],
        out_specs=(
            pl.BlockSpec((tm, Dp), tiled),      # out_feat tile
            pl.BlockSpec((tm, Cp), tiled),      # fused out1|out2 tile (lane-dense)
        ),
        compiler_params=pltpu.CompilerParams(
            dimension_semantics=("parallel",),
            vmem_limit_bytes=48 * 1024 * 1024,
        ),
    )(a_p, x_src, x_row, w_sr, bl_p, wc_p)

    out_feat = feat_p[:N, :D]
    out1 = out_p[:N, :C1]
    out2 = out_p[:N, C1:C1 + C2]
    return out1, out2, out_feat


def _reference(x, edge_index, params):
    """Pure-JAX f32 reference matching the PyTorch semantics."""
    N, D = x.shape
    src, dst = edge_index[0], edge_index[1]
    counts = jnp.zeros((N, N), jnp.float32).at[dst, src].add(1.0)
    in_deg = counts.sum(axis=1, keepdims=True)
    a = counts / jnp.maximum(in_deg, 1.0)
    agg = a @ x
    x1 = agg @ params["wl"] + params["bl"][None, :] + x @ params["wr"]

    def norm(v, axis):
        return v / jnp.maximum(jnp.linalg.norm(v, axis=axis, keepdims=True), EPS)

    xn = norm(x1, 1)
    out1 = xn @ norm(params["w1"], 0)
    out2 = xn @ norm(params["w2"], 0)
    return out1, out2, x1


def init_params(key, x_dim, shared_classes, total_classes):
    k = jax.random.split(key, 5)
    bound = 1.0 / jnp.sqrt(x_dim)
    wl = jax.random.uniform(k[0], (x_dim, x_dim), jnp.float32, -bound, bound)
    bl = jax.random.uniform(k[1], (x_dim,), jnp.float32, -bound, bound)
    wr = jax.random.uniform(k[2], (x_dim, x_dim), jnp.float32, -bound, bound)

    def normed_init(kk, out_features):
        w = jax.random.uniform(kk, (x_dim, out_features), jnp.float32, -1.0, 1.0)
        return w / jnp.maximum(jnp.linalg.norm(w, axis=0, keepdims=True), EPS)

    w1 = normed_init(k[3], shared_classes)
    w2 = normed_init(k[4], total_classes)
    return {"wl": wl, "bl": bl, "wr": wr, "w1": w1, "w2": w2}


if __name__ == "__main__":
    key = jax.random.PRNGKey(0)
    k_x, k_e, k_p = jax.random.split(key, 3)

    N, X_DIM, SHARED, TOTAL, E = 16, 32, 8, 12, 48
    x = jax.random.normal(k_x, (N, X_DIM), jnp.float32)
    edge_index = jax.random.randint(k_e, (2, E), 0, N, dtype=jnp.int32)
    params = init_params(k_p, X_DIM, SHARED, TOTAL)

    out1, out2, out_feat = jax.jit(encoder_modified2)(x, edge_index, params)
    jax.block_until_ready((out1, out2, out_feat))

    r1, r2, rf = _reference(x, edge_index, params)
    assert out_feat.shape == rf.shape and out1.shape == r1.shape and out2.shape == r2.shape
    assert jnp.allclose(out_feat, rf, rtol=1e-2, atol=1e-2)
    assert jnp.allclose(out1, r1, rtol=1e-2, atol=1e-2)
    assert jnp.allclose(out2, r2, rtol=1e-2, atol=1e-2)

    print("KERNEL_OK")
</pallas_src>

<mosaic_0001>
module attributes {stable_mosaic.version = 11 : i64} {
  func.func private @main(%arg0: i32) attributes {dimension_semantics = [#tpu.dimension_semantics<core_parallel>], iteration_bounds = array<i64: 2>, tpu.core_type = #tpu.core_type<sc_scalar_subcore>, window_params = []} {
    return
  }
}

module attributes {stable_mosaic.version = 11 : i64} {
  func.func private @main(%arg0: i32) attributes {dimension_semantics = [#tpu.dimension_semantics<core_parallel>], iteration_bounds = array<i64: 2>, tpu.core_type = #tpu.core_type<sc_scalar_subcore>, window_params = []} {
    return
  }
}

module attributes {stable_mosaic.version = 11 : i64} {
  func.func @_encoder_kernel(%arg0: i32, %arg1: memref<16x128xbf16, #tpu.memory_space<vmem>>, %arg2: memref<128x128xbf16, #tpu.memory_space<vmem>>, %arg3: memref<16x128xf32, #tpu.memory_space<vmem>>, %arg4: memref<256x128xf32, #tpu.memory_space<vmem>>, %arg5: memref<1x128xf32, #tpu.memory_space<vmem>>, %arg6: memref<128x128xf32, #tpu.memory_space<vmem>>, %arg7: memref<16x128xf32, #tpu.memory_space<vmem>>, %arg8: memref<16x128xf32, #tpu.memory_space<vmem>>) attributes {dimension_semantics = [#tpu.dimension_semantics<parallel>], iteration_bounds = array<i64: 1>, scalar_prefetch = 0 : i64, scratch_operands = 0 : i64, tpu.core_type = #tpu.core_type<tc>, window_params = [{transform_indices = @transform_0, window_bounds = array<i64: 16, 128>}, {pipeline_mode = #tpu.pipeline_mode<synchronous>, transform_indices = @transform_1, window_bounds = array<i64: 128, 128>}, {transform_indices = @transform_2, window_bounds = array<i64: 16, 128>}, {pipeline_mode = #tpu.pipeline_mode<synchronous>, transform_indices = @transform_3, window_bounds = array<i64: 256, 128>}, {pipeline_mode = #tpu.pipeline_mode<synchronous>, transform_indices = @transform_4, window_bounds = array<i64: 1, 128>}, {pipeline_mode = #tpu.pipeline_mode<synchronous>, transform_indices = @transform_5, window_bounds = array<i64: 128, 128>}, {transform_indices = @transform_6, window_bounds = array<i64: 16, 128>}, {transform_indices = @transform_7, window_bounds = array<i64: 16, 128>}]} {
    %c0 = arith.constant 0 : index
    %c0_0 = arith.constant 0 : index
    %0 = vector.load %arg1[%c0, %c0_0] : memref<16x128xbf16, #tpu.memory_space<vmem>>, vector<16x128xbf16>
    %c0_1 = arith.constant 0 : index
    %c0_2 = arith.constant 0 : index
    %1 = vector.load %arg2[%c0_1, %c0_2] : memref<128x128xbf16, #tpu.memory_space<vmem>>, vector<128x128xbf16>
    %cst = arith.constant dense<0.000000e+00> : vector<16x128xf32>
    %2 = tpu.matmul %0, %1, %cst {dimension_numbers = #tpu.dot_dimension_numbers<[1], [0], [0], [1], [0, 0, 1, 1], [], []>} : vector<16x128xbf16>, vector<128x128xbf16>, vector<16x128xf32> -> vector<16x128xf32>
    %c0_3 = arith.constant 0 : index
    %c0_4 = arith.constant 0 : index
    %3 = vector.load %arg3[%c0_3, %c0_4] : memref<16x128xf32, #tpu.memory_space<vmem>>, vector<16x128xf32>
    %4 = tpu.concatenate %2, %3 in 1 : vector<16x128xf32>, vector<16x128xf32> -> vector<16x256xf32>
    %c0_5 = arith.constant 0 : index
    %c0_6 = arith.constant 0 : index
    %5 = vector.load %arg4[%c0_5, %c0_6] : memref<256x128xf32, #tpu.memory_space<vmem>>, vector<256x128xf32>
    %cst_7 = arith.constant dense<0.000000e+00> : vector<16x128xf32>
    %6 = tpu.matmul %4, %5, %cst_7 {dimension_numbers = #tpu.dot_dimension_numbers<[1], [0], [0], [1], [0, 0, 1, 1], [], []>} : vector<16x256xf32>, vector<256x128xf32>, vector<16x128xf32> -> vector<16x128xf32>
    %c0_8 = arith.constant 0 : index
    %c0_9 = arith.constant 0 : index
    %7 = vector.load %arg5[%c0_8, %c0_9] : memref<1x128xf32, #tpu.memory_space<vmem>>, vector<1x128xf32>
    %8 = vector.broadcast %7 : vector<1x128xf32> to vector<16x128xf32>
    %9 = arith.addf %6, %8 : vector<16x128xf32>
    %c0_10 = arith.constant 0 : index
    %c0_11 = arith.constant 0 : index
    %10 = vector.load %arg7[%c0_10, %c0_11] : memref<16x128xf32, #tpu.memory_space<vmem>>, vector<16x128xf32>
    tpu.vector_store %arg7[%c0_10, %c0_11], %9 {strides = array<i32>} : memref<16x128xf32, #tpu.memory_space<vmem>>, vector<16x128xf32>,
    %11 = arith.mulf %9, %9 : vector<16x128xf32>
    %cst_12 = arith.constant dense<0.000000e+00> : vector<16xf32>
    %12 = vector.multi_reduction <add>, %11, %cst_12 [1] : vector<16x128xf32> to vector<16xf32>
    %13 = vector.shape_cast %12 : vector<16xf32> to vector<16x1xf32>
    %14 = math.sqrt %13 : vector<16x1xf32>
    %cst_13 = arith.constant 9.99999996E-13 : f32
    %15 = vector.broadcast %cst_13 : f32 to vector<16x1xf32>
    %16 = arith.maximumf %14, %15 : vector<16x1xf32>
    %17 = tpu.reciprocal %16 {approx = true} : vector<16x1xf32> -> vector<16x1xf32>
    %c0_14 = arith.constant 0 : index
    %c0_15 = arith.constant 0 : index
    %18 = vector.load %arg6[%c0_14, %c0_15] : memref<128x128xf32, #tpu.memory_space<vmem>>, vector<128x128xf32>
    %cst_16 = arith.constant dense<0.000000e+00> : vector<16x128xf32>
    %19 = tpu.matmul %9, %18, %cst_16 {dimension_numbers = #tpu.dot_dimension_numbers<[1], [0], [0], [1], [0, 0, 1, 1], [], []>} : vector<16x128xf32>, vector<128x128xf32>, vector<16x128xf32> -> vector<16x128xf32>
    %20 = vector.broadcast %17 : vector<16x1xf32> to vector<16x128xf32>
    %21 = arith.mulf %19, %20 : vector<16x128xf32>
    %c0_17 = arith.constant 0 : index
    %c0_18 = arith.constant 0 : index
    %22 = vector.load %arg8[%c0_17, %c0_18] : memref<16x128xf32, #tpu.memory_space<vmem>>, vector<16x128xf32>
    tpu.vector_store %arg8[%c0_17, %c0_18], %21 {strides = array<i32>} : memref<16x128xf32, #tpu.memory_space<vmem>>, vector<16x128xf32>,
    return
  }
  func.func @transform_0(%arg0: i32) -> (i32, i32) {
    %c0_i32 = arith.constant 0 : i32
    %c0_i32_0 = arith.constant 0 : i32
    return %arg0, %c0_i32 : i32, i32
  }
  func.func @transform_1(%arg0: i32) -> (i32, i32) {
    %c0_i32 = arith.constant 0 : i32
    %c0_i32_0 = arith.constant 0 : i32
    %c0_i32_1 = arith.constant 0 : i32
    return %c0_i32, %c0_i32_0 : i32, i32
  }
  func.func @transform_2(%arg0: i32) -> (i32, i32) {
    %c0_i32 = arith.constant 0 : i32
    %c0_i32_0 = arith.constant 0 : i32
    return %arg0, %c0_i32 : i32, i32
  }
  func.func @transform_3(%arg0: i32) -> (i32, i32) {
    %c0_i32 = arith.constant 0 : i32
    %c0_i32_0 = arith.constant 0 : i32
    %c0_i32_1 = arith.constant 0 : i32
    return %c0_i32, %c0_i32_0 : i32, i32
  }
  func.func @transform_4(%arg0: i32) -> (i32, i32) {
    %c0_i32 = arith.constant 0 : i32
    %c0_i32_0 = arith.constant 0 : i32
    %c0_i32_1 = arith.constant 0 : i32
    return %c0_i32, %c0_i32_0 : i32, i32
  }
  func.func @transform_5(%arg0: i32) -> (i32, i32) {
    %c0_i32 = arith.constant 0 : i32
    %c0_i32_0 = arith.constant 0 : i32
    %c0_i32_1 = arith.constant 0 : i32
    return %c0_i32, %c0_i32_0 : i32, i32
  }
  func.func @transform_6(%arg0: i32) -> (i32, i32) {
    %c0_i32 = arith.constant 0 : i32
    %c0_i32_0 = arith.constant 0 : i32
    return %arg0, %c0_i32 : i32, i32
  }
  func.func @transform_7(%arg0: i32) -> (i32, i32) {
    %c0_i32 = arith.constant 0 : i32
    %c0_i32_0 = arith.constant 0 : i32
    return %arg0, %c0_i32 : i32, i32
  }
}

</mosaic_0001>

<bundles_post_ra>
// kernel: encoder_modified2.1
= control target key start
LH: loop header
LB: loop body
LE: loop exit
PB: predicated region body
PF: predicated region fallthrough
CT: control target
= control target key end

     0   :  { %v571_v1 = vmov 0.0   ;;  %vm572_vm0 = vmmov 0   ;;  %s805_s0 = inlined_call_operand.vmem [shape: bf16[16,128], index: 0, kind: input, shape index: {}]   ;;  %s806_s1 = inlined_call_operand.vmem [shape: bf16[128,128], index: 1, kind: input, shape index: {}]   ;;  %s807_s2 = inlined_call_operand.vmem [shape: f32[16,128], index: 2, kind: input, shape index: {}]   ;;  %s808_s3 = inlined_call_operand.vmem [shape: f32[256,128], index: 3, kind: input, shape index: {}]   ;;  %s809_s4 = inlined_call_operand.vmem [shape: f32[1,128], index: 4, kind: input, shape index: {}]   ;;  %s810_s5 = inlined_call_operand.vmem [shape: f32[128,128], index: 5, kind: input, shape index: {}]   ;;  %s811_s6 = inlined_call_operand.hbm [shape: f32[16,128], index: 6, kind: output, shape index: {0}]   ;;  %s812_s7 = inlined_call_operand.vmem [shape: f32[16,128], index: 7, kind: output, shape index: {1}]  }
   0x1   :  { %v532_v0 = vld [vmem:[%s806_s1 + $0x38] sm:$0xff]   ;;  %472 = vmatprep.subr.bf16.mxu0 %v571_v1  ;;  %v533_v2 = vld [vmem:[%s806_s1 + $0x30] sm:$0xff]   ;;  %488 = vmatprep.mubr.msk.bf16.mxu0 %vm572_vm0, %v571_v1  ;;  %v534_v3 = vld [vmem:[%s806_s1 + $0x28] sm:$0xff]  }
   0x2   :  { %473 = vmatpush3.bf16.msra.mxu0 %v532_v0  ;;  %v173_v4 = vld [vmem:[%s808_s3 + $0xf8] sm:$0xff]  ;;  %v172_v6 = vld [vmem:[%s808_s3 + $0xf0] sm:$0xff]  ;;  %v535_v7 = vld [vmem:[%s806_s1 + $0x20] sm:$0xff]  }
   0x3   :  { %474 = vmatprep.subr.bf16.mxu0 %v571_v1  ;;  %v157_v5 = vld [vmem:[%s808_s3 + $0x78] sm:$0xff]  ;;  %416 = vmatprep.subr.mxu1 %v173_v4  ;;  %v156_v8 = vld [vmem:[%s808_s3 + $0x70] sm:$0xff]  ;;  %v171_v9 = vld [vmem:[%s808_s3 + $0xe8] sm:$0xff] }
   0x4   :  { %417 = vmatpush3.msra.mxu1 %v157_v5  ;;  %v155_v10 = vld [vmem:[%s808_s3 + $0x68] sm:$0xff]  ;;  %v170_v11 = vld [vmem:[%s808_s3 + $0xe0] sm:$0xff]  ;;  %v536_v12 = vld [vmem:[%s806_s1 + $0x18] sm:$0xff]  }
   0x5   :  { %418 = vmatprep.subr.mxu1 %v172_v6  ;;  %v154_v13 = vld [vmem:[%s808_s3 + $0x60] sm:$0xff]  ;;  %v169_v14 = vld [vmem:[%s808_s3 + $0xd8] sm:$0xff]  ;;  %v168_v16 = vld [vmem:[%s808_s3 + $0xd0] sm:$0xff] }
   0x6   :  { %475 = vmatpush3.bf16.msra.mxu0 %v533_v2  ;;  %419 = vmatpush3.msra.mxu1 %v156_v8  ;;  %v153_v15 = vld [vmem:[%s808_s3 + $0x58] sm:$0xff]  ;;  %v537_v17 = vld [vmem:[%s806_s1 + $0x10] sm:$0xff]   ;;  %v167_v19 = vld [vmem:[%s808_s3 + $0xc8] sm:$0xff] }
   0x7   :  { %476 = vmatprep.subr.bf16.mxu0 %v571_v1  ;;  %420 = vmatprep.subr.mxu1 %v171_v9  ;;  %v152_v18 = vld [vmem:[%s808_s3 + $0x50] sm:$0xff] }
   0x8   :  { %421 = vmatpush3.msra.mxu1 %v155_v10 }
   0x9   :  { %422 = vmatprep.subr.mxu1 %v170_v11 }
   0xa   :  { %477 = vmatpush3.bf16.msra.mxu0 %v534_v3  ;;  %423 = vmatpush3.msra.mxu1 %v154_v13 }
   0xb   :  { %478 = vmatprep.subr.bf16.mxu0 %v571_v1  ;;  %424 = vmatprep.subr.mxu1 %v169_v14 }
   0xc   :  { %425 = vmatpush3.msra.mxu1 %v153_v15 }
   0xe   :  { %479 = vmatpush3.bf16.msra.mxu0 %v535_v7 }
   0xf   :  { %480 = vmatprep.subr.bf16.mxu0 %v571_v1 }
  0x12   :  { %481 = vmatpush3.bf16.msra.mxu0 %v536_v12 }
  0x13   :  { %482 = vmatprep.subr.bf16.mxu0 %v571_v1 }
  0x14   :  { %13 = vsyncpa [#allocation3], 0  ;;  %426 = vmatprep.subr.mxu1 %v168_v16  ;;  %v151_v20 = vld [vmem:[%s808_s3 + $0x48] sm:$0xff]  ;;  %v166_v21 = vld [vmem:[%s808_s3 + $0xc0] sm:$0xff] }
  0x15   :  { %427 = vmatpush3.msra.mxu1 %v152_v18  ;;  %v538_v22 = vld [vmem:[%s806_s1 + $0x8] sm:$0xff]   ;;  %v150_v23 = vld [vmem:[%s808_s3 + $0x40] sm:$0xff]  ;;  %v165_v24 = vld [vmem:[%s808_s3 + $0xb8] sm:$0xff] }
  0x16   :  { %483 = vmatpush3.bf16.msra.mxu0 %v537_v17  ;;  %428 = vmatprep.subr.mxu1 %v167_v19  ;;  %v149_v25 = vld [vmem:[%s808_s3 + $0x38] sm:$0xff]  ;;  %v164_v26 = vld [vmem:[%s808_s3 + $0xb0] sm:$0xff]  ;;  %v539_v27 = vld [vmem:[%s806_s1] sm:$0xff]  }
  0x17   :  { %484 = vmatprep.subr.bf16.mxu0 %v571_v1  ;;  %429 = vmatpush3.msra.mxu1 %v151_v20  ;;  %v148_v28 = vld [vmem:[%s808_s3 + $0x30] sm:$0xff]  ;;  %v163_v29 = vld [vmem:[%s808_s3 + $0xa8] sm:$0xff]  ;;  %v540_v31 = vld [vmem:[%s805_s0] sm:$0xff]  }
  0x18   :  { %430 = vmatprep.subr.mxu1 %v166_v21  ;;  %v147_v30 = vld [vmem:[%s808_s3 + $0x28] sm:$0xff]  ;;  %v162_v32 = vld [vmem:[%s808_s3 + $0xa0] sm:$0xff]  ;;  %v161_v34 = vld [vmem:[%s808_s3 + $0x98] sm:$0xff] }
  0x19   :  { %431 = vmatpush3.msra.mxu1 %v150_v23  ;;  %v146_v33 = vld [vmem:[%s808_s3 + $0x20] sm:$0xff]  ;;  %v145_v35 = vld [vmem:[%s808_s3 + $0x18] sm:$0xff]  ;;  %v160_v36 = vld [vmem:[%s808_s3 + $0x90] sm:$0xff] }
  0x1a   :  { %485 = vmatpush3.bf16.msra.mxu0 %v538_v22  ;;  %432 = vmatprep.subr.mxu1 %v165_v24  ;;  %v144_v37 = vld [vmem:[%s808_s3 + $0x10] sm:$0xff]  ;;  %v159_v38 = vld [vmem:[%s808_s3 + $0x88] sm:$0xff]  ;;  %v158_v40 = vld [vmem:[%s808_s3 + $0x80] sm:$0xff] }
  0x1b   :  { %486 = vmatprep.subr.bf16.mxu0 %v571_v1  ;;  %433 = vmatpush3.msra.mxu1 %v149_v25  ;;  %v143_v39 = vld [vmem:[%s808_s3 + $0x8] sm:$0xff]  ;;  %v142_v41 = vld [vmem:[%s808_s3] sm:$0xff]  ;;  %v297_v43 = vld [vmem:[%s810_s5 + $0x78] sm:$0xff] }
  0x1c   :  { %434 = vmatprep.subr.mxu1 %v164_v26  ;;  %v140_v42 = vld [vmem:[%s807_s2] sm:$0xff]  ;;  %v296_v44 = vld [vmem:[%s810_s5 + $0x70] sm:$0xff]  ;;  %v295_v45 = vld [vmem:[%s810_s5 + $0x68] sm:$0xff] }
  0x1d   :  { %435 = vmatpush3.msra.mxu1 %v148_v28  ;;  %245 = vmatprep.mubr.f32.mxu1 %v140_v42  ;;  %v294_v46 = vld [vmem:[%s810_s5 + $0x60] sm:$0xff]  ;;  %v293_v47 = vld [vmem:[%s810_s5 + $0x58] sm:$0xff]  ;;  %v292_v48 = vld [vmem:[%s810_s5 + $0x50] sm:$0xff] }
  0x1e   :  { %487 = vmatpush3.bf16.msra.mxu0 %v539_v27  ;;  %436 = vmatprep.subr.mxu1 %v163_v29  ;;  %v291_v49 = vld [vmem:[%s810_s5 + $0x48] sm:$0xff]  ;;  %v290_v50 = vld [vmem:[%s810_s5 + $0x40] sm:$0xff]  ;;  %v289_v51 = vld [vmem:[%s810_s5 + $0x38] sm:$0xff] }
  0x1f   :  { %437 = vmatpush3.msra.mxu1 %v147_v30  ;;  %492 = vmatprep.subr.mxu0 %v297_v43  ;;  %v288_v52 = vld [vmem:[%s810_s5 + $0x30] sm:$0xff]  ;;  %v287_v53 = vld [vmem:[%s810_s5 + $0x28] sm:$0xff]  ;;  %v286_v59 = vld [vmem:[%s810_s5 + $0x20] sm:$0xff] }
  0x20   :  { %438 = vmatprep.subr.mxu1 %v162_v32  ;;  %v141_v54 = vld [vmem:[%s807_s2 + $0x8] sm:$0xff]  ;;  %v285_v60 = vld [vmem:[%s810_s5 + $0x18] sm:$0xff]  ;;  %v284_v61 = vld [vmem:[%s810_s5 + $0x10] sm:$0xff] }
  0x21   :  { %489 = vmatmul.mubr.bf16.vlgmr.msra.gmra.mxu0 %v540_v31  ;;  %439 = vmatpush3.msra.mxu1 %v146_v33  ;;  %v283_v62 = vld [vmem:[%s810_s5 + $0x8] sm:$0xff]  ;;  %v282_v63 = vld [vmem:[%s810_s5] sm:$0xff]  ;;  %s573_s5 = smov [#allocation2]  }
  0x22   :  { %440 = vmatprep.subr.mxu1 %v161_v34  ;;  %493 = vmatpush3.msra.mxu0 %v297_v43  ;;  %v406_v1 = vld [vmem:[%s809_s4] ss:$0 sm:$0xff]  ;;  %s382_s21 = sshll.u32 %s573_s5, 4  ;;  %s383_s21 = int_to_ptr.vmem [resolvable:$true] %s382_s21 }
  0x23   :  { %441 = vmatpush3.msra.mxu1 %v145_v35  ;;  %494 = vmatprep.subr.mxu0 %v296_v44  ;;  %s549_s22 = scalar_lea.vmem %s383_s21, 256  ;;  %p554_p1 = scmp.lt.s32.totalorder %s383_s21, %s383_s21 }
  0x24   :  { %442 = vmatprep.subr.mxu1 %v160_v36  ;;  %495 = vmatpush3.msra.mxu0 %v296_v44  ;;  %p550_p0 = scmp.ne.s32.totalorder %s383_s21, %s549_s22  ;;  %p555_p2 = scmp.lt.s32.totalorder %s549_s22, %s549_s22 }
  0x25   :  { %443 = vmatpush3.msra.mxu1 %v144_v37  ;;  %496 = vmatprep.subr.mxu0 %v295_v45 }
  0x26   :  { %444 = vmatprep.subr.mxu1 %v159_v38  ;;  %497 = vmatpush3.msra.mxu0 %v295_v45  ;;  %p556_p3 = por %p555_p2, %p554_p1 }
  0x27   :  { %445 = vmatpush3.msra.mxu1 %v143_v39  ;;  %498 = vmatprep.subr.mxu0 %v294_v46 }
  0x28   :  { %446 = vmatprep.subr.mxu1 %v158_v40  ;;  %499 = vmatpush3.msra.mxu0 %v294_v46  ;;  %p557_p4 = pnand %p556_p3, %p550_p0 }
  0x29   :  { %447 = vmatpush3.msra.mxu1 %v142_v41  ;;  %500 = vmatprep.subr.mxu0 %v293_v47 }
  0x2a   :  { %501 = vmatpush3.msra.mxu0 %v293_v47 }
  0x2b   :  { %502 = vmatprep.subr.mxu0 %v292_v48 }
  0x2c   :  { %503 = vmatpush3.msra.mxu0 %v292_v48 }
  0x2d   :  { %504 = vmatprep.subr.mxu0 %v291_v49 }
  0x2e   :  { %505 = vmatpush3.msra.mxu0 %v291_v49 }
  0x2f   :  { %506 = vmatprep.subr.mxu0 %v290_v50 }
  0x30   :  { %507 = vmatpush3.msra.mxu0 %v290_v50 }
  0x31   :  { %508 = vmatprep.subr.mxu0 %v289_v51 }
  0x32   :  { %509 = vmatpush3.msra.mxu0 %v289_v51 }
  0x33   :  { %510 = vmatprep.subr.mxu0 %v288_v52 }
  0x34   :  { %511 = vmatpush3.msra.mxu0 %v288_v52 }
  0x35   :  { %512 = vmatprep.subr.mxu0 %v287_v53 }
  0x36   :  { %513 = vmatpush3.msra.mxu0 %v287_v53 }
  0x37   :  { %514 = vmatprep.subr.mxu0 %v286_v59 }
  0x38   :  { %515 = vmatpush3.msra.mxu0 %v286_v59 }
  0x39   :  { %516 = vmatprep.subr.mxu0 %v285_v60 }
  0x3a   :  { %517 = vmatpush3.msra.mxu0 %v285_v60 }
  0x3b   :  { %518 = vmatprep.subr.mxu0 %v284_v61 }
  0x3c   :  { %519 = vmatpush3.msra.mxu0 %v284_v61 }
  0x3d   :  { %520 = vmatprep.subr.mxu0 %v283_v62 }
  0x3e   :  { %521 = vmatpush3.msra.mxu0 %v283_v62 }
  0x3f   :  { %522 = vmatprep.subr.mxu0 %v282_v63 }
  0x40   :  { %523 = vmatpush3.msra.mxu0 %v282_v63 }
  0xe1   :  { %v133_v55 = vpop.f32.mrf.mxu0 }
  0xe2   :  { %246 = vmatmul.mubr.f32.vlgmr.msra.gmra.mxu1 %v133_v55 }
  0xe3   :  { %v490_v56 = vpop.f32.mrf.mxu0  ;;  %250 = vmatprep.mubr.f32.mxu1 %v141_v54 }
  0xe5   :  { %v136_v57 = vpop.f32.mrf.mxu0 }
  0xe6   :  { %251 = vmatmul.mubr.f32.gmra.mxu1 %v136_v57 }
  0xe7   :  { %v491_v58 = vpop.f32.mrf.mxu0 }
 0x1a2   :  { %v448_v0 = vpop.f32.mrf.mxu1 }
 0x1a4   :  { %v449_v2 = vpop.f32.mrf.mxu1 }
 0x1a5   :  { %v450_v3 = vadd.f32 %v449_v2, %v448_v0 }
 0x1a6   :  { %v451_v4 = vpop.f32.mrf.mxu1 }
 0x1a7   :  { %v248_v5 = vadd.f32 %v450_v3, %v406_v1 }
 0x1a8   :  { %v452_v6 = vpop.f32.mrf.mxu1 }
 0x1a9   :  { %256 = vst [vmem:[#allocation2] sm:$0xff] %v248_v5  ;;  %v453_v7 = vadd.f32 %v452_v6, %v451_v4  ;;  %524 = vmatprep.mubr.f32.mxu0 %v248_v5  ;;  %v258_v8 = vmul.f32 %v248_v5, %v248_v5 }
 0x1ab   :  { %v253_v9 = vadd.f32 %v453_v7, %v406_v1  ;;  %260 = vadd.xlane.f32.xlu0 %v258_v8 }
 0x1ad   :  { %257 = vst [vmem:[#allocation2 + $0x8] sm:$0xff] %v253_v9  ;;  %525 = vmatmul.mubr.f32.vlgmr.msra.gmra.mxu0 %v253_v9  ;;  %v259_v10 = vmul.f32 %v253_v9, %v253_v9 }
 0x1af   :  { %262 = vadd.xlane.f32.xlu0 %v259_v10 }
 0x1b0   :  { %560 = shalt.err (!%p557_p4)
}
 0x1b1   :  { %s574_s4 = smov 128   ;;  %s575_s23 = smov 8  }
 0x1b2   :  { %388 = dma.vmem_to_hbm [thread:$0]  %s383_s21, 256, %s811_s6, [#allocation3], %s574_s4, %s574_s4, %s575_s23  }
 0x234   :  { %v261_v11 = vpop.xlane.xlu0 %260 }
 0x235   :  { %vm266_vm2 = vcmp.eq.f32.partialorder %v261_v11, inf  ;;  %v269_v20 = vand.u32 2147483648, %v261_v11  ;;  %vm268_vm4 = vcmp.eq.f32.partialorder %v261_v11, 0.0 }
 0x238   :  { %v263_v12 = vpop.xlane.xlu0 %262 }
 0x239   :  { %541 = vrsqrt.f32 %v263_v12  ;;  %vm273_vm1 = vcmp.eq.f32.partialorder %v263_v12, inf  ;;  %v276_v18 = vand.u32 2147483648, %v263_v12  ;;  %vm275_vm3 = vcmp.eq.f32.partialorder %v263_v12, 0.0 }
 0x23a   :  { %543 = vrsqrt.f32 %v261_v11 }
 0x246   :  { %v542_v13 = vpop.eup %541 }
 0x247   :  { %v544_v14 = vpop.eup %543  ;;  %v272_v15 = vmul.f32 %v542_v13, %v263_v12 }
 0x248   :  { %v265_v16 = vmul.f32 %v544_v14, %v261_v11 }
 0x249   :  { %v274_v17 = vsel %vm273_vm1, %v263_v12, %v272_v15 }
 0x24a   :  { %v267_v19 = vsel %vm266_vm2, %v261_v11, %v265_v16  ;;  %v277_v21 = vsel %vm275_vm3, %v276_v18, %v274_v17 }
 0x24b   :  { %v270_v22 = vsel %vm268_vm4, %v269_v20, %v267_v19  ;;  %v279_v23 = vmax.f32 %v277_v21, 1e-12 }
 0x24c   :  { %v278_v24 = vmax.f32 %v270_v22, 1e-12 }
 0x24d   :  { %545 = vrcp.f32 %v279_v23 }
 0x24e   :  { %547 = vrcp.f32 %v278_v24 }
 0x25a   :  { %v546_v25 = vpop.eup %545 }
 0x25b   :  { %v548_v28 = vpop.eup %547 }
 0x26d   :  { %v526_v26 = vpop.f32.mrf.mxu0 }
 0x26e   :  { %v374_v27 = vmul.f32 %v546_v25, %v526_v26 }
 0x26f   :  { %v364_v29 = vpop.f32.mrf.mxu0 }
 0x270   :  { %376 = vst [vmem:[%s812_s7 + $0x8] sm:$0xff] %v374_v27  ;;  %v373_v30 = vmul.f32 %v548_v28, %v364_v29 }
 0x272   :  { %375 = vst [vmem:[%s812_s7] sm:$0xff] %v373_v30 }
 0x273   :  { %569 = dma.done.wait [#allocation3], 256  }
 0x274   :  { %570 = vsyncadd [#allocation3], 4294967040 }
 0x275   :  { %396 = vsyncpa [#allocation3], 1 }

</bundles_post_ra>
